<compile_context>
chip_gen: v7x
topology: tpu7x:2x2x1
jax: 0.10.0
libtpu: 0.0.40
codegen_flags: <defaults>
</compile_context>

<pallas_src>
import functools

import jax
import jax.numpy as jnp
from jax import lax
from jax.experimental import pallas as pl
from jax.experimental.pallas import tpu as pltpu

LANE = 128
SUBLANE = 8


def _round_up(x, m):
    return (x + m - 1) // m * m


def _grid_pad(n, target):
    """Pad n to a 128 multiple, pick tile=min(target, n128), re-pad n to tile.

    Avoids the old fallback that shrank tiles to 128 when n_pad wasn't
    divisible by the target (measured ~3x HBM-roofline regression)."""
    n128 = _round_up(max(n, 1), LANE)
    tile = min(target, n128)
    return _round_up(n128, tile), tile


def _pad2(a, rows, cols):
    return jnp.pad(a, ((0, rows - a.shape[0]), (0, cols - a.shape[1])))


def _vmem_limit_bytes():
    """~96 MiB on v5e/v6e (128 MiB physical VMEM), ~48 MiB on v7x (64 MiB/TC)."""
    try:
        cap = pltpu.get_tpu_info().vmem_capacity_bytes
    except Exception:  # pragma: no cover - info query unavailable
        cap = 64 << 20
    return max(32 << 20, min(96 << 20, (cap * 3) // 4))


def _xwl_resident_ok(n_pad, c_pad, tm, tk, vmem_limit):
    """Can the full bf16 hi/lo X@Wl panel live in VMEM next to the streamed tiles?"""
    resident = 2 * (n_pad * c_pad * 2) * 2        # hi + lo panels, bf16, 2 bufs
    stream = (tm * tk * 2) * 2                    # A mask tile, bf16, 2 bufs
    stream += (tm * c_pad * 4) * 2 * 2            # XWr in + out tiles, f32, 2 bufs
    stream += tm * c_pad * 4                      # f32 accumulator scratch
    return resident + stream < (vmem_limit * 4) // 5


# ----------------------------- Pallas kernels ------------------------------

def _xw_kernel(x_ref, w_ref, b_ref, hi_ref, lo_ref, xwr_ref):
    """Fused feature transform Y = X @ [Wl | Wr] + [0 | b].

    The X@Wl half is stored as a bf16 hi/lo pair (so the O(N^2) aggregation
    matmul runs on the bf16 MXU path with ~f32 accuracy); X@Wr + b stays f32.
    """
    c = hi_ref.shape[1]
    y = (jnp.dot(x_ref[...], w_ref[...], preferred_element_type=jnp.float32)
         + b_ref[...])
    xwl = y[:, :c]
    hi = xwl.astype(jnp.bfloat16)
    hi_ref[...] = hi
    lo_ref[...] = (xwl - hi.astype(jnp.float32)).astype(jnp.bfloat16)
    xwr_ref[...] = y[:, c:]


def _agg_kernel(a_ref, hi_ref, lo_ref, xwr_ref, rs_ref, o_ref, acc_ref, *,
                apply_relu, resident, tk):
    """out = (1/deg) * (A_mask @ XWl) + (XWr + b), optional ReLU.

    Gridded (row tile i, contraction tile k).  bf16 x bf16 MXU matmuls (hi +
    residual) into an f32 VMEM accumulator.  With `resident`, the whole XWl
    panel lives in VMEM (fetched once) and the k-slice is taken in-kernel.
    """
    k = pl.program_id(1)

    @pl.when(k == 0)
    def _():
        acc_ref[...] = jnp.zeros_like(acc_ref)

    if resident:
        start = pl.multiple_of(k * tk, tk)
        hi = hi_ref[pl.ds(start, tk), :]
        lo = lo_ref[pl.ds(start, tk), :]
    else:
        hi = hi_ref[...]
        lo = lo_ref[...]

    a = a_ref[...]
    acc_ref[...] += (jnp.dot(a, hi, preferred_element_type=jnp.float32)
                     + jnp.dot(a, lo, preferred_element_type=jnp.float32))

    @pl.when(k == pl.num_programs(1) - 1)
    def _():
        out = acc_ref[...] * rs_ref[...] + xwr_ref[...]
        if apply_relu:
            out = jnp.maximum(out, 0.0)
        o_ref[...] = out.astype(o_ref.dtype)


def _gram_kernel(za_ref, zb_ref, o_ref):
    """prob_adj tile = z_i @ z_j^T, contracting last dims (no in-kernel transpose)."""
    o_ref[...] = lax.dot_general(
        za_ref[...], zb_ref[...],
        dimension_numbers=(((1,), (1,)), ((), ())),
        preferred_element_type=jnp.float32)


def _decode_kernel(za_ref, zb_ref, mul_ref, sum_ref):
    """Link decoder tile: elementwise product + row-sum (lane-dense store)."""
    m = za_ref[...] * zb_ref[...]
    mul_ref[...] = m
    s = jnp.sum(m, axis=-1, keepdims=True)
    sum_ref[...] = jnp.broadcast_to(s, sum_ref.shape)


# ------------------------------- wrappers -----------------------------------

def feature_transform(x_pad, w_cat, b_cat, *, tm, vmem_limit):
    n_pad, c_in_pad = x_pad.shape
    c2 = w_cat.shape[1]
    c_pad = c2 // 2
    return pl.pallas_call(
        _xw_kernel,
        out_shape=(jax.ShapeDtypeStruct((n_pad, c_pad), jnp.bfloat16),
                   jax.ShapeDtypeStruct((n_pad, c_pad), jnp.bfloat16),
                   jax.ShapeDtypeStruct((n_pad, c_pad), jnp.float32)),
        grid_spec=pltpu.PrefetchScalarGridSpec(
            num_scalar_prefetch=0,
            grid=(n_pad // tm,),
            in_specs=[
                pl.BlockSpec((tm, c_in_pad), lambda i: (i, 0)),
                pl.BlockSpec((c_in_pad, c2), lambda i: (0, 0)),
                pl.BlockSpec((1, c2), lambda i: (0, 0)),
            ],
            out_specs=(pl.BlockSpec((tm, c_pad), lambda i: (i, 0)),
                       pl.BlockSpec((tm, c_pad), lambda i: (i, 0)),
                       pl.BlockSpec((tm, c_pad), lambda i: (i, 0))),
        ),
        compiler_params=pltpu.CompilerParams(
            dimension_semantics=("parallel",),
            vmem_limit_bytes=vmem_limit,
        ),
    )(x_pad, w_cat, b_cat)


def sage_layer(a_mask, rscale, x_pad, w_cat, b_cat, *, apply_relu, tm, tk,
               vmem_limit):
    """One SAGEConv layer on padded operands."""
    n_pad = a_mask.shape[0]
    c2 = w_cat.shape[1]
    c_pad = c2 // 2

    # Fused feature transform: bf16 hi/lo X@Wl + f32 (X@Wr + b).
    xwl_hi, xwl_lo, xwr = feature_transform(
        x_pad, w_cat, b_cat, tm=tm, vmem_limit=vmem_limit)

    resident = _xwl_resident_ok(n_pad, c_pad, tm, tk, vmem_limit)
    if resident:
        def make_xwl_spec():
            return pl.BlockSpec((n_pad, c_pad), lambda i, k: (0, 0))
    else:
        def make_xwl_spec():
            return pl.BlockSpec((tk, c_pad), lambda i, k: (k, 0))

    kernel = functools.partial(_agg_kernel, apply_relu=apply_relu,
                               resident=resident, tk=tk)
    return pl.pallas_call(
        kernel,
        out_shape=jax.ShapeDtypeStruct((n_pad, c_pad), jnp.float32),
        grid_spec=pltpu.PrefetchScalarGridSpec(
            num_scalar_prefetch=0,
            grid=(n_pad // tm, n_pad // tk),
            in_specs=[
                pl.BlockSpec((tm, tk), lambda i, k: (i, k)),      # A mask tile
                make_xwl_spec(),                                  # X@Wl hi
                make_xwl_spec(),                                  # X@Wl lo
                pl.BlockSpec((tm, c_pad), lambda i, k: (i, 0)),   # X@Wr + b
                pl.BlockSpec((tm, 1), lambda i, k: (i, 0)),       # 1/deg
            ],
            out_specs=pl.BlockSpec((tm, c_pad), lambda i, k: (i, 0)),
            scratch_shapes=[pltpu.VMEM((tm, c_pad), jnp.float32)],
        ),
        compiler_params=pltpu.CompilerParams(
            dimension_semantics=("parallel", "arbitrary"),
            vmem_limit_bytes=vmem_limit,
        ),
    )(a_mask, xwl_hi, xwl_lo, xwr, rscale)


def gram(z_pad, *, tg, vmem_limit):
    n_pad, c_pad = z_pad.shape
    return pl.pallas_call(
        _gram_kernel,
        out_shape=jax.ShapeDtypeStruct((n_pad, n_pad), jnp.float32),
        grid_spec=pltpu.PrefetchScalarGridSpec(
            num_scalar_prefetch=0,
            grid=(n_pad // tg, n_pad // tg),
            in_specs=[
                pl.BlockSpec((tg, c_pad), lambda i, j: (i, 0)),  # fixed over j
                pl.BlockSpec((tg, c_pad), lambda i, j: (j, 0)),
            ],
            out_specs=pl.BlockSpec((tg, tg), lambda i, j: (i, j)),
        ),
        compiler_params=pltpu.CompilerParams(
            dimension_semantics=("parallel", "parallel"),
            vmem_limit_bytes=vmem_limit,
        ),
    )(z_pad, z_pad)


def decode(za_pad, zb_pad, *, tr, vmem_limit):
    l_pad, c_pad = za_pad.shape
    mul, s = pl.pallas_call(
        _decode_kernel,
        out_shape=(jax.ShapeDtypeStruct((l_pad, c_pad), jnp.float32),
                   jax.ShapeDtypeStruct((l_pad, LANE), jnp.float32)),
        grid_spec=pltpu.PrefetchScalarGridSpec(
            num_scalar_prefetch=0,
            grid=(l_pad // tr,),
            in_specs=[pl.BlockSpec((tr, c_pad), lambda i: (i, 0)),
                      pl.BlockSpec((tr, c_pad), lambda i: (i, 0))],
            out_specs=(pl.BlockSpec((tr, c_pad), lambda i: (i, 0)),
                       pl.BlockSpec((tr, LANE), lambda i: (i, 0))),
        ),
        compiler_params=pltpu.CompilerParams(
            dimension_semantics=("parallel",),
            vmem_limit_bytes=vmem_limit,
        ),
    )(za_pad, zb_pad)
    return mul, s[:, 0]


def build_mean_adj(edge_index, n_pad):
    """bf16 edge-count mask (dst rows, src cols) + f32 1/deg row scale."""
    # TODO(synk): bf16 count mask is exact only up to edge multiplicity 256;
    # multigraphs heavier than that need an f32 mask (or the sparse kernel).
    src, dst = edge_index[0], edge_index[1]
    counts = jnp.zeros((n_pad, n_pad), jnp.float32).at[dst, src].add(1.0)
    deg = counts.sum(axis=1, keepdims=True)
    rscale = jnp.where(deg > 0, 1.0 / jnp.maximum(deg, 1.0), 0.0)
    return counts.astype(jnp.bfloat16), rscale.astype(jnp.float32)


def _cat_weights(wl_t, wr_t, b, c_in_pad, c_pad):
    """[Wl_pad | Wr_pad] and [0 | b_pad] for the fused feature transform."""
    wl = _pad2(wl_t, c_in_pad, c_pad)
    wr = _pad2(wr_t, c_in_pad, c_pad)
    w_cat = jnp.concatenate([wl, wr], axis=1)
    b_pad = jnp.pad(b, (0, c_pad - b.shape[0]))
    b_cat = jnp.concatenate(
        [jnp.zeros((c_pad,), jnp.float32), b_pad]).reshape(1, 2 * c_pad)
    return w_cat, b_cat


def sage_forward(params, x, edge_index, edge_label_index):
    n, c_in = x.shape
    hid = params["b1"].shape[0]
    c_out = params["b2"].shape[0]

    vmem_limit = _vmem_limit_bytes()

    n_pad, tile = _grid_pad(n, 512)        # 512-class tiles, n padded to fit
    c_in_pad = _round_up(c_in, LANE)
    hid_pad = _round_up(hid, LANE)
    c_out_pad = _round_up(c_out, LANE)

    tm = tile   # aggregation / feature-transform row tile
    tk = tile   # contraction tile over A columns
    tg = tile   # gram tile

    a_mask, rscale = build_mean_adj(edge_index, n_pad)
    x_pad = _pad2(x, n_pad, c_in_pad)

    w_cat1, b_cat1 = _cat_weights(params["wl1_t"], params["wr1_t"],
                                  params["b1"], c_in_pad, hid_pad)
    w_cat2, b_cat2 = _cat_weights(params["wl2_t"], params["wr2_t"],
                                  params["b2"], hid_pad, c_out_pad)

    outputs = {}
    h_pad = sage_layer(a_mask, rscale, x_pad, w_cat1, b_cat1,
                       apply_relu=True, tm=tm, tk=tk, vmem_limit=vmem_limit)
    outputs["sage1"] = h_pad[:n, :hid]
    z_pad = sage_layer(a_mask, rscale, h_pad, w_cat2, b_cat2,
                       apply_relu=False, tm=tm, tk=tk, vmem_limit=vmem_limit)
    outputs["sage2"] = z_pad[:n, :c_out]

    # Edge-endpoint gather stays in plain JAX (glue).
    # TODO(synk): for very large L, fold the gather into the decode kernel via
    # PrefetchScalarGridSpec + pl.Element row indexing on z.
    l = edge_label_index.shape[1]
    l8 = _round_up(l, SUBLANE)
    tr = min(512, l8)
    l_pad = _round_up(l8, tr)
    ei0 = jnp.pad(edge_label_index[0], (0, l_pad - l))
    ei1 = jnp.pad(edge_label_index[1], (0, l_pad - l))
    mul_pad, sum_pad = decode(z_pad[ei0], z_pad[ei1], tr=tr,
                              vmem_limit=vmem_limit)
    outputs["decode_mul"] = mul_pad[:l, :c_out]
    outputs["decode_sum"] = sum_pad[:l]

    prob_adj = gram(z_pad, tg=tg, vmem_limit=vmem_limit)[:n, :n]
    outputs["prob_adj"] = prob_adj
    # TODO(synk): (prob_adj > 0).nonzero().t() has a data-dependent output
    # shape; computed eagerly outside any Pallas kernel / jit.
    outputs["decode_all_final"] = jnp.argwhere(prob_adj > 0).T
    return outputs


# ------------------------------- reference ----------------------------------

def sage_forward_ref(params, x, edge_index, edge_label_index):
    n = x.shape[0]
    src, dst = edge_index[0], edge_index[1]
    a = jnp.zeros((n, n), jnp.float32).at[dst, src].add(1.0)
    deg = a.sum(axis=1, keepdims=True)
    a_mean = jnp.where(deg > 0, a / jnp.maximum(deg, 1.0), 0.0)

    def layer(xx, wl_t, wr_t, b):
        return (a_mean @ xx) @ wl_t + b + xx @ wr_t

    h = jnp.maximum(layer(x, params["wl1_t"], params["wr1_t"], params["b1"]), 0.0)
    z = layer(h, params["wl2_t"], params["wr2_t"], params["b2"])
    mul = z[edge_label_index[0]] * z[edge_label_index[1]]
    return h, z, mul, mul.sum(-1), z @ z.T


# --------------------------------- main --------------------------------------

if __name__ == "__main__":
    key = jax.random.PRNGKey(0)
    N, C_IN, HID, C_OUT = 16, 8, 32, 16
    E, L = 40, 8

    ks = jax.random.split(key, 10)
    x = jax.random.normal(ks[0], (N, C_IN), jnp.float32)
    edge_index = jax.random.randint(ks[1], (2, E), 0, N, jnp.int32)
    edge_label_index = jax.random.randint(ks[2], (2, L), 0, N, jnp.int32)

    def init_linear(kw, c_in, c_out):
        # shape-compatible with nn.Linear(c_in, c_out); passed pre-transposed.
        w = jax.random.normal(kw, (c_out, c_in), jnp.float32) * 0.1
        return w.T  # [c_in, c_out]

    params = {
        "wl1_t": init_linear(ks[3], C_IN, HID),
        "wr1_t": init_linear(ks[4], C_IN, HID),
        "b1": jax.random.normal(ks[5], (HID,), jnp.float32) * 0.1,
        "wl2_t": init_linear(ks[6], HID, C_OUT),
        "wr2_t": init_linear(ks[7], HID, C_OUT),
        "b2": jax.random.normal(ks[8], (C_OUT,), jnp.float32) * 0.1,
    }

    outs = sage_forward(params, x, edge_index, edge_label_index)
    jax.block_until_ready(outs["prob_adj"])

    # sanity check against plain-JAX reference (bf16 hi/lo split keeps ~2^-16
    # relative accuracy on the aggregated term -> 5e-4 tolerance is ample).
    h_r, z_r, mul_r, sum_r, pa_r = sage_forward_ref(params, x, edge_index,
                                                    edge_label_index)
    TOL = dict(atol=5e-4, rtol=5e-4)
    assert jnp.allclose(outs["sage1"], h_r, **TOL)
    assert jnp.allclose(outs["sage2"], z_r, **TOL)
    assert jnp.allclose(outs["decode_mul"], mul_r, **TOL)
    assert jnp.allclose(outs["decode_sum"], sum_r, **TOL)
    assert jnp.allclose(outs["prob_adj"], pa_r, **TOL)

    print("KERNEL_OK")
</pallas_src>

<mosaic_0001>
module attributes {stable_mosaic.version = 11 : i64} {
  func.func @_xw_kernel(%arg0: i32, %arg1: memref<128x128xf32, #tpu.memory_space<vmem>>, %arg2: memref<128x256xf32, #tpu.memory_space<vmem>>, %arg3: memref<1x256xf32, #tpu.memory_space<vmem>>, %arg4: memref<128x128xbf16, #tpu.memory_space<vmem>>, %arg5: memref<128x128xbf16, #tpu.memory_space<vmem>>, %arg6: memref<128x128xf32, #tpu.memory_space<vmem>>) attributes {dimension_semantics = [#tpu.dimension_semantics<parallel>], iteration_bounds = array<i64: 1>, scalar_prefetch = 0 : i64, scratch_operands = 0 : i64, tpu.core_type = #tpu.core_type<tc>, window_params = [{transform_indices = @transform_0, window_bounds = array<i64: 128, 128>}, {pipeline_mode = #tpu.pipeline_mode<synchronous>, transform_indices = @transform_1, window_bounds = array<i64: 128, 256>}, {pipeline_mode = #tpu.pipeline_mode<synchronous>, transform_indices = @transform_2, window_bounds = array<i64: 1, 256>}, {transform_indices = @transform_3, window_bounds = array<i64: 128, 128>}, {transform_indices = @transform_4, window_bounds = array<i64: 128, 128>}, {transform_indices = @transform_5, window_bounds = array<i64: 128, 128>}]} {
    %c0 = arith.constant 0 : index
    %c0_0 = arith.constant 0 : index
    %0 = vector.load %arg1[%c0, %c0_0] : memref<128x128xf32, #tpu.memory_space<vmem>>, vector<128x128xf32>
    %c0_1 = arith.constant 0 : index
    %c0_2 = arith.constant 0 : index
    %1 = vector.load %arg2[%c0_1, %c0_2] : memref<128x256xf32, #tpu.memory_space<vmem>>, vector<128x256xf32>
    %cst = arith.constant dense<0.000000e+00> : vector<128x256xf32>
    %2 = tpu.matmul %0, %1, %cst {dimension_numbers = #tpu.dot_dimension_numbers<[1], [0], [0], [1], [0, 0, 1, 1], [], []>} : vector<128x128xf32>, vector<128x256xf32>, vector<128x256xf32> -> vector<128x256xf32>
    %c0_3 = arith.constant 0 : index
    %c0_4 = arith.constant 0 : index
    %3 = vector.load %arg3[%c0_3, %c0_4] : memref<1x256xf32, #tpu.memory_space<vmem>>, vector<1x256xf32>
    %4 = vector.broadcast %3 : vector<1x256xf32> to vector<128x256xf32>
    %5 = arith.addf %2, %4 : vector<128x256xf32>
    %6 = vector.extract_strided_slice %5 {offsets = [0, 0], sizes = [128, 128], strides = [1, 1]} : vector<128x256xf32> to vector<128x128xf32>
    %7 = arith.truncf %6 : vector<128x128xf32> to vector<128x128xbf16>
    %c0_5 = arith.constant 0 : index
    %c0_6 = arith.constant 0 : index
    %8 = vector.load %arg4[%c0_5, %c0_6] : memref<128x128xbf16, #tpu.memory_space<vmem>>, vector<128x128xbf16>
    tpu.vector_store %arg4[%c0_5, %c0_6], %7 {strides = array<i32>} : memref<128x128xbf16, #tpu.memory_space<vmem>>, vector<128x128xbf16>,
    %9 = arith.extf %7 : vector<128x128xbf16> to vector<128x128xf32>
    %10 = arith.subf %6, %9 : vector<128x128xf32>
    %11 = arith.truncf %10 : vector<128x128xf32> to vector<128x128xbf16>
    %c0_7 = arith.constant 0 : index
    %c0_8 = arith.constant 0 : index
    %12 = vector.load %arg5[%c0_7, %c0_8] : memref<128x128xbf16, #tpu.memory_space<vmem>>, vector<128x128xbf16>
    tpu.vector_store %arg5[%c0_7, %c0_8], %11 {strides = array<i32>} : memref<128x128xbf16, #tpu.memory_space<vmem>>, vector<128x128xbf16>,
    %13 = vector.extract_strided_slice %5 {offsets = [0, 128], sizes = [128, 128], strides = [1, 1]} : vector<128x256xf32> to vector<128x128xf32>
    %c0_9 = arith.constant 0 : index
    %c0_10 = arith.constant 0 : index
    %14 = vector.load %arg6[%c0_9, %c0_10] : memref<128x128xf32, #tpu.memory_space<vmem>>, vector<128x128xf32>
    tpu.vector_store %arg6[%c0_9, %c0_10], %13 {strides = array<i32>} : memref<128x128xf32, #tpu.memory_space<vmem>>, vector<128x128xf32>,
    return
  }
  func.func @transform_0(%arg0: i32) -> (i32, i32) {
    %c0_i32 = arith.constant 0 : i32
    %c0_i32_0 = arith.constant 0 : i32
    return %arg0, %c0_i32 : i32, i32
  }
  func.func @transform_1(%arg0: i32) -> (i32, i32) {
    %c0_i32 = arith.constant 0 : i32
    %c0_i32_0 = arith.constant 0 : i32
    %c0_i32_1 = arith.constant 0 : i32
    return %c0_i32, %c0_i32_0 : i32, i32
  }
  func.func @transform_2(%arg0: i32) -> (i32, i32) {
    %c0_i32 = arith.constant 0 : i32
    %c0_i32_0 = arith.constant 0 : i32
    %c0_i32_1 = arith.constant 0 : i32
    return %c0_i32, %c0_i32_0 : i32, i32
  }
  func.func @transform_3(%arg0: i32) -> (i32, i32) {
    %c0_i32 = arith.constant 0 : i32
    %c0_i32_0 = arith.constant 0 : i32
    return %arg0, %c0_i32 : i32, i32
  }
  func.func @transform_4(%arg0: i32) -> (i32, i32) {
    %c0_i32 = arith.constant 0 : i32
    %c0_i32_0 = arith.constant 0 : i32
    return %arg0, %c0_i32 : i32, i32
  }
  func.func @transform_5(%arg0: i32) -> (i32, i32) {
    %c0_i32 = arith.constant 0 : i32
    %c0_i32_0 = arith.constant 0 : i32
    return %arg0, %c0_i32 : i32, i32
  }
}

</mosaic_0001>

<bundles_post_ra>
// kernel: tpu_custom_call.1
= control target key start
LH: loop header
LB: loop body
LE: loop exit
PB: predicated region body
PF: predicated region fallthrough
CT: control target
= control target key end

     0   :  { %11 = vsyncpa [#allocation3], 0  ;;  %s1037_s0 = inlined_call_operand.hbm [shape: f32[128,128], index: 0, kind: input, shape index: {}]   ;;  %s1038_s1 = inlined_call_operand.hbm [shape: f32[128,256], index: 1, kind: input, shape index: {}]   ;;  %s1039_s2 = inlined_call_operand.vmem [shape: f32[1,256], index: 2, kind: input, shape index: {}]   ;;  %s1040_s3 = inlined_call_operand.hbm [shape: bf16[128,128], index: 3, kind: output, shape index: {0}]   ;;  %s1041_s4 = inlined_call_operand.hbm [shape: bf16[128,128], index: 4, kind: output, shape index: {1}]   ;;  %s1042_s5 = inlined_call_operand.hbm [shape: f32[128,128], index: 5, kind: output, shape index: {2}]  }
   0x1   :  { %12 = vsyncpa [#allocation6], 0 }
   0x2   :  { %13 = vsyncpa [#allocation4], 0 }
   0x3   :  { %14 = vsyncpa [#allocation9], 0  ;;  %s861_s18 = smov [#allocation2]   ;;  %s743_s22 = scalar_lea.hbm %s1037_s0, 2048 }
   0x4   :  { %s20_s19 = sshll.u32 %s861_s18, 4  ;;  %p744_p0 = scmp.ne.s32.totalorder %s1037_s0, %s743_s22  ;;  %s21_s19 = int_to_ptr.vmem [resolvable:$true] %s20_s19 }
   0x5   :  { %p747_p1 = scmp.lt.u32.totalorder %s743_s22, %s1037_s0 }
   0x7   :  { %p749_p2 = pnand %p747_p1, %p744_p0 }
   0x9   :  { %752 = shalt.err (!%p749_p2)
}
   0xa   :  { %s753_s27 = scalar_lea.vmem %s21_s19, 2048  ;;  %p758_p4 = scmp.lt.s32.totalorder %s21_s19, %s21_s19 }
   0xb   :  { %p754_p3 = scmp.ne.s32.totalorder %s21_s19, %s753_s27  ;;  %p759_p5 = scmp.lt.s32.totalorder %s753_s27, %s753_s27 }
   0xd   :  { %p760_p6 = por %p759_p5, %p758_p4 }
   0xf   :  { %p761_p7 = pnand %p760_p6, %p754_p3 }
  0x11   :  { %764 = shalt.err (!%p761_p7)
}
  0x12   :  { %s862_s28 = smov 128   ;;  %s863_s29 = smov 8  }
  0x13   :  { %26 = dma.hbm_to_vmem [thread:$0]  %s1037_s0, 2048, %s21_s19, [#allocation3], %s862_s28, %s862_s28, %s863_s29  }
  0x14   :  { %s864_s7 = smov [#allocation5]   ;;  %s765_s11 = scalar_lea.hbm %s1038_s1, 4096 }
  0x15   :  { %s32_s8 = sshll.u32 %s864_s7, 4  ;;  %p766_p8 = scmp.ne.s32.totalorder %s1038_s1, %s765_s11  ;;  %s33_s8 = int_to_ptr.vmem [resolvable:$true] %s32_s8 }
  0x16   :  { %p769_p9 = scmp.lt.u32.totalorder %s765_s11, %s1038_s1 }
  0x18   :  { %p771_p10 = pnand %p769_p9, %p766_p8 }
  0x1a   :  { %774 = shalt.err (!%p771_p10)
}
  0x1b   :  { %s775_s16 = scalar_lea.vmem %s33_s8, 4096  ;;  %p780_p12 = scmp.lt.s32.totalorder %s33_s8, %s33_s8 }
  0x1c   :  { %p776_p11 = scmp.ne.s32.totalorder %s33_s8, %s775_s16  ;;  %p781_p13 = scmp.lt.s32.totalorder %s775_s16, %s775_s16 }
  0x1e   :  { %p782_p0 = por %p781_p13, %p780_p12 }
  0x20   :  { %p783_p1 = pnand %p782_p0, %p776_p11 }
  0x22   :  { %786 = shalt.err (!%p783_p1)
}
  0x23   :  { %s865_s0 = smov 256   ;;  %s866_s17 = smov 16  }
  0x24   :  { %38 = dma.hbm_to_vmem [thread:$0]  %s1038_s1, 4096, %s33_s8, [#allocation6], %s865_s0, %s865_s0, %s866_s17  }
  0x25   :  { %853 = dma.done.wait [#allocation3], 2048  }
  0x26   :  { %854 = vsyncadd [#allocation3], 4294965248 }
  0x27   :  { %855 = dma.done.wait [#allocation6], 4096  }
  0x28   :  { %856 = vsyncadd [#allocation6], 4294963200  ;;  %v867_v0 = vmov 0.0   ;;  %v64_v1 = vld [vmem:[#allocation5 + $0x8] sm:$0xff]  ;;  %v66_v2 = vld [vmem:[#allocation5 + $0x18] sm:$0xff]  ;;  %s869_s22 = smov [#allocation8]  }
  0x29   :  { %171 = vmatprep.mubr.f32.mxu0 %v867_v0  ;;  %219 = vmatprep.mubr.f32.mxu1 %v867_v0  ;;  %v63_v3 = vld [vmem:[#allocation5] sm:$0xff]  ;;  %v683_v4 = vpack.c.bf16 %v66_v2, %v64_v1  ;;  %v65_v5 = vld [vmem:[#allocation5 + $0x10] sm:$0xff]  ;;  %v68_v6 = vld [vmem:[#allocation5 + $0x28] sm:$0xff]  ;;  %v97_v2 = vlaneseq  ;;  %s493_s23 = sshll.u32 %s869_s22, 4  ;;  %s494_s23 = int_to_ptr.vmem [resolvable:$true] %s493_s23 }
  0x2a   :  { %v70_v7 = vld [vmem:[#allocation5 + $0x38] sm:$0xff]  ;;  %v685_v8 = vpack.c.bf16 %v65_v5, %v63_v3  ;;  %v67_v10 = vld [vmem:[#allocation5 + $0x20] sm:$0xff]  ;;  %v69_v11 = vld [vmem:[#allocation5 + $0x30] sm:$0xff] }
  0x2b   :  { %v687_v9 = vpack.c.bf16 %v70_v7, %v68_v6  ;;  %v72_v12 = vld [vmem:[#allocation5 + $0x48] sm:$0xff]  ;;  %684 = vmatprep.subr.bf16.mxu0 %v683_v4  ;;  %715 = vmatprep.subr.bf16.mxu1 %v683_v4  ;;  %v74_v13 = vld [vmem:[#allocation5 + $0x58] sm:$0xff]  ;;  %v689_v14 = vpack.c.bf16 %v69_v11, %v67_v10  ;;  %v71_v16 = vld [vmem:[#allocation5 + $0x40] sm:$0xff]  ;;  %v98_v3 = vshrl.u32 %v97_v2, 7 }
  0x2c   :  { %686 = vmatpush1.bf16.msra.mxu0 %v685_v8  ;;  %723 = vmatpush1.bf16.msra.mxu1 %v685_v8  ;;  %v691_v15 = vpack.c.bf16 %v74_v13, %v72_v12  ;;  %v73_v17 = vld [vmem:[#allocation5 + $0x50] sm:$0xff]  ;;  %v76_v18 = vld [vmem:[#allocation5 + $0x68] sm:$0xff]  ;;  %v78_v19 = vld [vmem:[#allocation5 + $0x78] sm:$0xff] }
  0x2d   :  { %688 = vmatprep.subr.bf16.mxu0 %v687_v9  ;;  %716 = vmatprep.subr.bf16.mxu1 %v687_v9  ;;  %v693_v20 = vpack.c.bf16 %v73_v17, %v71_v16  ;;  %v695_v21 = vpack.c.bf16 %v78_v19, %v76_v18  ;;  %v75_v22 = vld [vmem:[#allocation5 + $0x60] sm:$0xff]  ;;  %v77_v23 = vld [vmem:[#allocation5 + $0x70] sm:$0xff]  ;;  %v80_v24 = vld [vmem:[#allocation5 + $0x88] sm:$0xff]  ;;  %v103_v4 = vsub.s32 1, %v98_v3  ;;  %v99_v6 = vsub.s32 0, %v98_v3 }
  0x2e   :  { %v82_v25 = vld [vmem:[#allocation5 + $0x98] sm:$0xff]  ;;  %v697_v26 = vpack.c.bf16 %v77_v23, %v75_v22  ;;  %v79_v28 = vld [vmem:[#allocation5 + $0x80] sm:$0xff]  ;;  %v81_v29 = vld [vmem:[#allocation5 + $0x90] sm:$0xff] }
  0x2f   :  { %v699_v27 = vpack.c.bf16 %v82_v25, %v80_v24  ;;  %v84_v30 = vld [vmem:[#allocation5 + $0xa8] sm:$0xff]  ;;  %v86_v31 = vld [vmem:[#allocation5 + $0xb8] sm:$0xff]  ;;  %v701_v32 = vpack.c.bf16 %v81_v29, %v79_v28  ;;  %v83_v34 = vld [vmem:[#allocation5 + $0xa0] sm:$0xff] }
  0x30   :  { %690 = vmatpush1.bf16.msra.mxu0 %v689_v14  ;;  %724 = vmatpush1.bf16.msra.mxu1 %v689_v14  ;;  %v703_v33 = vpack.c.bf16 %v86_v31, %v84_v30  ;;  %v85_v35 = vld [vmem:[#allocation5 + $0xb0] sm:$0xff]  ;;  %v88_v36 = vld [vmem:[#allocation5 + $0xc8] sm:$0xff]  ;;  %v90_v37 = vld [vmem:[#allocation5 + $0xd8] sm:$0xff] }
  0x31   :  { %692 = vmatprep.subr.bf16.mxu0 %v691_v15  ;;  %717 = vmatprep.subr.bf16.mxu1 %v691_v15  ;;  %v705_v38 = vpack.c.bf16 %v85_v35, %v83_v34  ;;  %v707_v39 = vpack.c.bf16 %v90_v37, %v88_v36  ;;  %v87_v40 = vld [vmem:[#allocation5 + $0xc0] sm:$0xff]  ;;  %v89_v41 = vld [vmem:[#allocation5 + $0xd0] sm:$0xff]  ;;  %v92_v42 = vld [vmem:[#allocation5 + $0xe8] sm:$0xff] }
  0x32   :  { %v94_v43 = vld [vmem:[#allocation5 + $0xf8] sm:$0xff]  ;;  %v709_v44 = vpack.c.bf16 %v89_v41, %v87_v40  ;;  %v91_v46 = vld [vmem:[#allocation5 + $0xe0] sm:$0xff]  ;;  %v93_v47 = vld [vmem:[#allocation5 + $0xf0] sm:$0xff] }
  0x33   :  { %v711_v45 = vpack.c.bf16 %v94_v43, %v92_v42  ;;  %v713_v48 = vpack.c.bf16 %v93_v47, %v91_v46  ;;  %v47_v49 = vld [vmem:[#allocation2] sm:$0xff]  ;;  %v48_v51 = vld [vmem:[#allocation2 + $0x8] sm:$0xff]  ;;  %v49_v53 = vld [vmem:[#allocation2 + $0x10] sm:$0xff] }
  0x34   :  { %694 = vmatpush1.bf16.msra.mxu0 %v693_v20  ;;  %725 = vmatpush1.bf16.msra.mxu1 %v693_v20  ;;  %v55_v50 = vld [vmem:[#allocation2 + $0x40] sm:$0xff]  ;;  %v56_v52 = vld [vmem:[#allocation2 + $0x48] sm:$0xff]  ;;  %v57_v54 = vld [vmem:[#allocation2 + $0x50] sm:$0xff] }
  0x35   :  { %696 = vmatprep.subr.bf16.mxu0 %v695_v21  ;;  %718 = vmatprep.subr.bf16.mxu1 %v695_v21  ;;  %v50_v55 = vld [vmem:[#allocation2 + $0x18] sm:$0xff]  ;;  %v51_v57 = vld [vmem:[#allocation2 + $0x20] sm:$0xff]  ;;  %v52_v59 = vld [vmem:[#allocation2 + $0x28] sm:$0xff] }
  0x36   :  { %v58_v56 = vld [vmem:[#allocation2 + $0x58] sm:$0xff]  ;;  %v59_v58 = vld [vmem:[#allocation2 + $0x60] sm:$0xff]  ;;  %v60_v60 = vld [vmem:[#allocation2 + $0x68] sm:$0xff] }
  0x37   :  { %v53_v61 = vld [vmem:[#allocation2 + $0x30] sm:$0xff]  ;;  %v54_v63 = vld [vmem:[#allocation2 + $0x38] sm:$0xff]  ;;  %v95_v5 = vld [vmem:[%s1039_s2] sm:$0x3]  ;;  %s868_s2 = smov [#allocation7]  }
  0x38   :  { %698 = vmatpush1.bf16.msra.mxu0 %v697_v26  ;;  %726 = vmatpush1.bf16.msra.mxu1 %v697_v26  ;;  %v61_v62 = vld [vmem:[#allocation2 + $0x70] sm:$0xff]  ;;  %v62_v1 = vld [vmem:[#allocation2 + $0x78] sm:$0xff]  ;;  %v949_v7 = vrot.slane %v95_v5, %v103_v4  ;;  %v951_v10 = vrot.slane %v95_v5, %v99_v6  ;;  %s481_s21 = sshll.u32 %s868_s2, 4  ;;  %s482_s21 = int_to_ptr.vmem [resolvable:$true] %s481_s21 }
  0x39   :  { %700 = vmatprep.subr.bf16.mxu0 %v699_v27  ;;  %719 = vmatprep.subr.bf16.mxu1 %v699_v27  ;;  %s787_s24 = scalar_lea.vmem %s482_s21, 1024  ;;  %p792_p3 = scmp.lt.s32.totalorder %s482_s21, %s482_s21 }
  0x3a   :  { %p788_p2 = scmp.ne.s32.totalorder %s482_s21, %s787_s24  ;;  %p793_p4 = scmp.lt.s32.totalorder %s787_s24, %s787_s24 }
  0x3c   :  { %702 = vmatpush1.bf16.msra.mxu0 %v701_v32  ;;  %727 = vmatpush1.bf16.msra.mxu1 %v701_v32  ;;  %p794_p5 = por %p793_p4, %p792_p3 }
  0x3d   :  { %704 = vmatprep.subr.bf16.mxu0 %v703_v33  ;;  %720 = vmatprep.subr.bf16.mxu1 %v703_v33 }
  0x3e   :  { %p795_p6 = pnand %p794_p5, %p788_p2 }
  0x40   :  { %706 = vmatpush1.bf16.msra.mxu0 %v705_v38  ;;  %728 = vmatpush1.bf16.msra.mxu1 %v705_v38 }
  0x41   :  { %708 = vmatprep.subr.bf16.mxu0 %v707_v39  ;;  %721 = vmatprep.subr.bf16.mxu1 %v707_v39 }
  0x44   :  { %710 = vmatpush1.bf16.msra.mxu0 %v709_v44  ;;  %729 = vmatpush1.bf16.msra.mxu1 %v709_v44 }
  0x45   :  { %712 = vmatprep.subr.bf16.mxu0 %v711_v45  ;;  %722 = vmatprep.subr.bf16.mxu1 %v711_v45 }
  0x48   :  { %714 = vmatpush1.bf16.msra.mxu0 %v713_v48  ;;  %730 = vmatpush1.bf16.msra.mxu1 %v713_v48 }
  0x4b   :  { %172 = vmatmul.mubr.f32.vlgmr.msra.gmra.mrb[0].mxu0 %v47_v49  ;;  %220 = vmatmul.mubr.f32.vlgmr.msra.gmra.mrb[0].mxu1 %v55_v50 }
  0x4c   :  { %177 = vmatprep.mubr.f32.mxu0 %v867_v0  ;;  %225 = vmatprep.mubr.f32.mxu1 %v867_v0 }
  0x4f   :  { %178 = vmatmul.mubr.f32.gmra.mrb[2].mxu0 %v48_v51  ;;  %226 = vmatmul.mubr.f32.gmra.mrb[2].mxu1 %v56_v52 }
  0x50   :  { %183 = vmatprep.mubr.f32.mxu0 %v867_v0  ;;  %231 = vmatprep.mubr.f32.mxu1 %v867_v0 }
  0x53   :  { %184 = vmatmul.mubr.f32.gmra.mrb[4].mxu0 %v49_v53  ;;  %232 = vmatmul.mubr.f32.gmra.mrb[4].mxu1 %v57_v54 }
  0x54   :  { %189 = vmatprep.mubr.f32.mxu0 %v867_v0  ;;  %237 = vmatprep.mubr.f32.mxu1 %v867_v0 }
  0x57   :  { %190 = vmatmul.mubr.f32.gmra.mrb[6].mxu0 %v50_v55  ;;  %238 = vmatmul.mubr.f32.gmra.mrb[6].mxu1 %v58_v56 }
  0x58   :  { %195 = vmatprep.mubr.f32.mxu0 %v867_v0  ;;  %243 = vmatprep.mubr.f32.mxu1 %v867_v0 }
  0x5b   :  { %196 = vmatmul.mubr.f32.gmra.mrb[8].mxu0 %v51_v57  ;;  %244 = vmatmul.mubr.f32.gmra.mrb[8].mxu1 %v59_v58 }
  0x5c   :  { %201 = vmatprep.mubr.f32.mxu0 %v867_v0  ;;  %249 = vmatprep.mubr.f32.mxu1 %v867_v0 }
  0x5f   :  { %202 = vmatmul.mubr.f32.gmra.mrb[10].mxu0 %v52_v59  ;;  %250 = vmatmul.mubr.f32.gmra.mrb[10].mxu1 %v60_v60 }
  0x60   :  { %207 = vmatprep.mubr.f32.mxu0 %v867_v0  ;;  %255 = vmatprep.mubr.f32.mxu1 %v867_v0 }
  0x63   :  { %208 = vmatmul.mubr.f32.gmra.mrb[12].mxu0 %v53_v61  ;;  %256 = vmatmul.mubr.f32.gmra.mrb[12].mxu1 %v61_v62 }
  0x64   :  { %213 = vmatprep.mubr.f32.mxu0 %v867_v0  ;;  %261 = vmatprep.mubr.f32.mxu1 %v867_v0 }
  0x67   :  { %214 = vmatmul.mubr.f32.gmra.mrb[14].mxu0 %v54_v63  ;;  %262 = vmatmul.mubr.f32.gmra.mrb[14].mxu1 %v62_v1 }
 0x11e   :  { %v173_v8 = vpop.f32.mrb[0].mxu0  ;;  %v221_v9 = vpop.f32.mrb[0].mxu1 }
 0x11f   :  { %v175_v11 = vpop.f32.mrb[1].mxu0  ;;  %v223_v0 = vpop.f32.mrb[1].mxu1  ;;  %v174_v16 = vadd.f32 %v173_v8, %v951_v10  ;;  %v222_v17 = vadd.f32 %v221_v9, %v951_v10 }
 0x120   :  { %v176_v12 = vadd.f32 %v175_v11, %v949_v7  ;;  %v224_v13 = vadd.f32 %v223_v0, %v949_v7 }
 0x122   :  { %460 = vst [vmem:[#allocation10] sm:$0xff] %v176_v12  ;;  %468 = vst [vmem:[#allocation10 + $0x40] sm:$0xff] %v224_v13  ;;  %v179_v14 = vpop.f32.mrb[2].mxu0  ;;  %v227_v15 = vpop.f32.mrb[2].mxu1 }
 0x123   :  { %v180_v18 = vadd.f32 %v179_v14, %v951_v10  ;;  %v228_v19 = vadd.f32 %v227_v15, %v951_v10  ;;  %v181_v20 = vpop.f32.mrb[3].mxu0  ;;  %v229_v21 = vpop.f32.mrb[3].mxu1 }
 0x124   :  { %v182_v22 = vadd.f32 %v181_v20, %v949_v7  ;;  %v230_v23 = vadd.f32 %v229_v21, %v949_v7 }
 0x125   :  { %v268_v24 = vpack.c.bf16 %v180_v18, %v174_v16  ;;  %v272_v25 = vpack.c.bf16 %v228_v19, %v222_v17 }
 0x126   :  { %461 = vst [vmem:[#allocation10 + $0x8] sm:$0xff] %v182_v22  ;;  %469 = vst [vmem:[#allocation10 + $0x48] sm:$0xff] %v230_v23  ;;  %v185_v26 = vpop.f32.mrb[4].mxu0  ;;  %v233_v27 = vpop.f32.mrb[4].mxu1 }
 0x127   :  { %593 = vst [vmem:[#allocation7] sm:$0xff] %v268_v24   ;;  %v348_v28 = vunpack.c.l.bf16 %v268_v24  ;;  %v349_v29 = vunpack.c.h.bf16 %v268_v24  ;;  %672 = vst [vmem:[#allocation7 + $0x20] sm:$0xff] %v272_v25   ;;  %v356_v30 = vunpack.c.l.bf16 %v272_v25  ;;  %v357_v31 = vunpack.c.h.bf16 %v272_v25  ;;  %v187_v32 = vpop.f32.mrb[5].mxu0  ;;  %v235_v33 = vpop.f32.mrb[5].mxu1 }
 0x128   :  { %v188_v34 = vadd.f32 %v187_v32, %v949_v7  ;;  %v236_v35 = vadd.f32 %v235_v33, %v949_v7  ;;  %v186_v40 = vadd.f32 %v185_v26, %v951_v10  ;;  %v234_v41 = vadd.f32 %v233_v27, %v951_v10 }
 0x129   :  { %v364_v36 = vsub.f32 %v174_v16, %v348_v28  ;;  %v365_v37 = vsub.f32 %v180_v18, %v349_v29  ;;  %v372_v38 = vsub.f32 %v222_v17, %v356_v30  ;;  %v373_v39 = vsub.f32 %v228_v19, %v357_v31 }
 0x12a   :  { %462 = vst [vmem:[#allocation10 + $0x10] sm:$0xff] %v188_v34  ;;  %470 = vst [vmem:[#allocation10 + $0x50] sm:$0xff] %v236_v35  ;;  %v191_v42 = vpop.f32.mrb[6].mxu0  ;;  %v239_v43 = vpop.f32.mrb[6].mxu1 }
 0x12b   :  { %v632_v44 = vpack.c.bf16 %v365_v37, %v364_v36  ;;  %v652_v45 = vpack.c.bf16 %v373_v39, %v372_v38  ;;  %v192_v46 = vadd.f32 %v191_v42, %v951_v10  ;;  %v240_v47 = vadd.f32 %v239_v43, %v951_v10  ;;  %v193_v48 = vpop.f32.mrb[7].mxu0  ;;  %v241_v49 = vpop.f32.mrb[7].mxu1 }
 0x12c   :  { %v194_v50 = vadd.f32 %v193_v48, %v949_v7  ;;  %v242_v51 = vadd.f32 %v241_v49, %v949_v7 }
 0x12d   :  { %633 = vst [vmem:[#allocation8] sm:$0xff] %v632_v44   ;;  %679 = vst [vmem:[#allocation8 + $0x20] sm:$0xff] %v652_v45   ;;  %v269_v52 = vpack.c.bf16 %v192_v46, %v186_v40  ;;  %v273_v53 = vpack.c.bf16 %v240_v47, %v234_v41 }
 0x12e   :  { %463 = vst [vmem:[#allocation10 + $0x18] sm:$0xff] %v194_v50  ;;  %471 = vst [vmem:[#allocation10 + $0x58] sm:$0xff] %v242_v51  ;;  %v197_v54 = vpop.f32.mrb[8].mxu0  ;;  %v245_v55 = vpop.f32.mrb[8].mxu1 }
 0x12f   :  { %669 = vst [vmem:[#allocation7 + $0x8] sm:$0xff] %v269_v52   ;;  %v350_v56 = vunpack.c.l.bf16 %v269_v52  ;;  %v351_v57 = vunpack.c.h.bf16 %v269_v52  ;;  %673 = vst [vmem:[#allocation7 + $0x28] sm:$0xff] %v273_v53   ;;  %v358_v58 = vunpack.c.l.bf16 %v273_v53  ;;  %v359_v59 = vunpack.c.h.bf16 %v273_v53  ;;  %v199_v60 = vpop.f32.mrb[9].mxu0  ;;  %v247_v61 = vpop.f32.mrb[9].mxu1 }
 0x130   :  { %v200_v62 = vadd.f32 %v199_v60, %v949_v7  ;;  %v248_v63 = vadd.f32 %v247_v61, %v949_v7  ;;  %v198_v5 = vadd.f32 %v197_v54, %v951_v10  ;;  %v246_v6 = vadd.f32 %v245_v55, %v951_v10 }
 0x131   :  { %v366_v1 = vsub.f32 %v186_v40, %v350_v56  ;;  %v367_v2 = vsub.f32 %v192_v46, %v351_v57  ;;  %v374_v3 = vsub.f32 %v234_v41, %v358_v58  ;;  %v375_v4 = vsub.f32 %v240_v47, %v359_v59 }
 0x132   :  { %464 = vst [vmem:[#allocation10 + $0x20] sm:$0xff] %v200_v62  ;;  %472 = vst [vmem:[#allocation10 + $0x60] sm:$0xff] %v248_v63  ;;  %v203_v8 = vpop.f32.mrb[10].mxu0  ;;  %v251_v9 = vpop.f32.mrb[10].mxu1 }
 0x133   :  { %v637_v11 = vpack.c.bf16 %v367_v2, %v366_v1  ;;  %v657_v0 = vpack.c.bf16 %v375_v4, %v374_v3  ;;  %v204_v12 = vadd.f32 %v203_v8, %v951_v10  ;;  %v252_v13 = vadd.f32 %v251_v9, %v951_v10  ;;  %v205_v14 = vpop.f32.mrb[11].mxu0  ;;  %v253_v15 = vpop.f32.mrb[11].mxu1 }
 0x134   :  { %v206_v16 = vadd.f32 %v205_v14, %v949_v7  ;;  %v254_v17 = vadd.f32 %v253_v15, %v949_v7 }
 0x135   :  { %676 = vst [vmem:[#allocation8 + $0x8] sm:$0xff] %v637_v11   ;;  %680 = vst [vmem:[#allocation8 + $0x28] sm:$0xff] %v657_v0   ;;  %v270_v18 = vpack.c.bf16 %v204_v12, %v198_v5  ;;  %v274_v19 = vpack.c.bf16 %v252_v13, %v246_v6 }
 0x136   :  { %465 = vst [vmem:[#allocation10 + $0x28] sm:$0xff] %v206_v16  ;;  %473 = vst [vmem:[#allocation10 + $0x68] sm:$0xff] %v254_v17  ;;  %v209_v20 = vpop.f32.mrb[12].mxu0  ;;  %v257_v21 = vpop.f32.mrb[12].mxu1 }
 0x137   :  { %670 = vst [vmem:[#allocation7 + $0x10] sm:$0xff] %v270_v18   ;;  %v352_v22 = vunpack.c.l.bf16 %v270_v18  ;;  %v353_v23 = vunpack.c.h.bf16 %v270_v18  ;;  %674 = vst [vmem:[#allocation7 + $0x30] sm:$0xff] %v274_v19   ;;  %v360_v24 = vunpack.c.l.bf16 %v274_v19  ;;  %v361_v25 = vunpack.c.h.bf16 %v274_v19  ;;  %v211_v26 = vpop.f32.mrb[13].mxu0  ;;  %v259_v27 = vpop.f32.mrb[13].mxu1 }
 0x138   :  { %v212_v28 = vadd.f32 %v211_v26, %v949_v7  ;;  %v260_v29 = vadd.f32 %v259_v27, %v949_v7  ;;  %v210_v34 = vadd.f32 %v209_v20, %v951_v10  ;;  %v258_v35 = vadd.f32 %v257_v21, %v951_v10 }
 0x139   :  { %v368_v30 = vsub.f32 %v198_v5, %v352_v22  ;;  %v369_v31 = vsub.f32 %v204_v12, %v353_v23  ;;  %v376_v32 = vsub.f32 %v246_v6, %v360_v24  ;;  %v377_v33 = vsub.f32 %v252_v13, %v361_v25 }
 0x13a   :  { %466 = vst [vmem:[#allocation10 + $0x30] sm:$0xff] %v212_v28  ;;  %474 = vst [vmem:[#allocation10 + $0x70] sm:$0xff] %v260_v29  ;;  %v215_v36 = vpop.f32.mrb[14].mxu0  ;;  %v263_v37 = vpop.f32.mrb[14].mxu1 }
 0x13b   :  { %v642_v38 = vpack.c.bf16 %v369_v31, %v368_v30  ;;  %v662_v39 = vpack.c.bf16 %v377_v33, %v376_v32  ;;  %v216_v40 = vadd.f32 %v215_v36, %v951_v10  ;;  %v264_v41 = vadd.f32 %v263_v37, %v951_v10  ;;  %v217_v42 = vpop.f32.mrb[15].mxu0  ;;  %v265_v43 = vpop.f32.mrb[15].mxu1 }
 0x13c   :  { %v218_v44 = vadd.f32 %v217_v42, %v949_v7  ;;  %v266_v45 = vadd.f32 %v265_v43, %v949_v7 }
 0x13d   :  { %677 = vst [vmem:[#allocation8 + $0x10] sm:$0xff] %v642_v38   ;;  %681 = vst [vmem:[#allocation8 + $0x30] sm:$0xff] %v662_v39   ;;  %v271_v46 = vpack.c.bf16 %v216_v40, %v210_v34  ;;  %v275_v47 = vpack.c.bf16 %v264_v41, %v258_v35 }
 0x13e   :  { %467 = vst [vmem:[#allocation10 + $0x38] sm:$0xff] %v218_v44  ;;  %475 = vst [vmem:[#allocation10 + $0x78] sm:$0xff] %v266_v45 }
 0x13f   :  { %671 = vst [vmem:[#allocation7 + $0x18] sm:$0xff] %v271_v46   ;;  %v354_v48 = vunpack.c.l.bf16 %v271_v46  ;;  %v355_v49 = vunpack.c.h.bf16 %v271_v46  ;;  %675 = vst [vmem:[#allocation7 + $0x38] sm:$0xff] %v275_v47   ;;  %v362_v50 = vunpack.c.l.bf16 %v275_v47  ;;  %v363_v51 = vunpack.c.h.bf16 %v275_v47 }
 0x140   :  { %798 = shalt.err (!%p795_p6)
}
 0x141   :  { %s799_s27 = scalar_lea.hbm %s1040_s3, 1024 }
 0x142   :  { %p800_p7 = scmp.ne.s32.totalorder %s1040_s3, %s799_s27  ;;  %p803_p8 = scmp.lt.u32.totalorder %s799_s27, %s1040_s3 }
 0x144   :  { %p805_p9 = pnand %p803_p8, %p800_p7 }
 0x146   :  { %808 = shalt.err (!%p805_p9)
}
 0x147   :  { %s870_s9 = smov 64   ;;  %s871_s10 = smov 4   ;;  %v370_v7 = vsub.f32 %v210_v34, %v354_v48  ;;  %v371_v10 = vsub.f32 %v216_v40, %v355_v49  ;;  %v378_v52 = vsub.f32 %v258_v35, %v362_v50  ;;  %v379_v53 = vsub.f32 %v264_v41, %v363_v51 }
 0x148   :  { %487 = dma.vmem_to_hbm [thread:$0]  %s482_s21, 1024, %s1040_s3, [#allocation4], %s870_s9, %s870_s9, %s871_s10  }
 0x149   :  { %s872_s13 = smov [#allocation10]   ;;  %v647_v54 = vpack.c.bf16 %v371_v10, %v370_v7  ;;  %v667_v55 = vpack.c.bf16 %v379_v53, %v378_v52  ;;  %s809_s15 = scalar_lea.vmem %s494_s23, 1024 }
 0x14a   :  { %s505_s14 = sshll.u32 %s872_s13, 4  ;;  %p810_p10 = scmp.ne.s32.totalorder %s494_s23, %s809_s15  ;;  %s1000_s14 = int_to_ptr.vmem [resolvable:$true] %s505_s14 }
 0x14b   :  { %678 = vst [vmem:[#allocation8 + $0x18] sm:$0xff] %v647_v54   ;;  %682 = vst [vmem:[#allocation8 + $0x38] sm:$0xff] %v667_v55   ;;  %p814_p11 = scmp.lt.s32.totalorder %s494_s23, %s494_s23  ;;  %p815_p12 = scmp.lt.s32.totalorder %s809_s15, %s809_s15 }
 0x14d   :  { %p816_p13 = por %p815_p12, %p814_p11 }
 0x14f   :  { %p817_p0 = pnand %p816_p13, %p810_p10 }
 0x151   :  { %820 = shalt.err (!%p817_p0)
}
 0x152   :  { %s821_s0 = scalar_lea.hbm %s1041_s4, 1024 }
 0x153   :  { %p822_p1 = scmp.ne.s32.totalorder %s1041_s4, %s821_s0  ;;  %p825_p2 = scmp.lt.u32.totalorder %s821_s0, %s1041_s4 }
 0x155   :  { %p827_p3 = pnand %p825_p2, %p822_p1 }
 0x157   :  { %830 = shalt.err (!%p827_p3)
}
 0x158   :  { %499 = dma.vmem_to_hbm [thread:$0]  %s494_s23, 1024, %s1041_s4, [#allocation9], %s870_s9, %s870_s9, %s871_s10  }
 0x159   :  { %s831_s21 = scalar_lea.vmem %s1000_s14, 2048  ;;  %p836_p5 = scmp.lt.s32.totalorder %s1000_s14, %s1000_s14 }
 0x15a   :  { %p832_p4 = scmp.ne.s32.totalorder %s1000_s14, %s831_s21  ;;  %p837_p6 = scmp.lt.s32.totalorder %s831_s21, %s831_s21 }
 0x15c   :  { %p838_p7 = por %p837_p6, %p836_p5 }
 0x15e   :  { %p839_p8 = pnand %p838_p7, %p832_p4 }
 0x160   :  { %842 = shalt.err (!%p839_p8)
}
 0x161   :  { %s843_s25 = scalar_lea.hbm %s1042_s5, 2048 }
 0x162   :  { %p844_p9 = scmp.ne.s32.totalorder %s1042_s5, %s843_s25  ;;  %p847_p10 = scmp.lt.u32.totalorder %s843_s25, %s1042_s5 }
 0x164   :  { %p849_p11 = pnand %p847_p10, %p844_p9 }
 0x166   :  { %852 = shalt.err (!%p849_p11)
}
 0x167   :  { %511 = dma.vmem_to_hbm [thread:$0]  %s1000_s14, 2048, %s1042_s5, [#allocation9], %s862_s28, %s862_s28, %s863_s29  }
 0x168   :  { %857 = dma.done.wait [#allocation4], 1024  }
 0x169   :  { %858 = vsyncadd [#allocation4], 4294966272 }
 0x16a   :  { %859 = dma.done.wait [#allocation9], 3072  }
 0x16b   :  { %860 = vsyncadd [#allocation9], 4294964224 }
 0x16c   :  { %521 = vsyncpa [#allocation3], 1 }
 0x16d   :  { %522 = vsyncpa [#allocation6], 1 }
 0x16e   :  { %523 = vsyncpa [#allocation4], 1 }
 0x16f   :  { %524 = vsyncpa [#allocation9], 1 }

</bundles_post_ra>
